<compile_context>
chip_gen: v5e
topology: v5e:2x2
jax: 0.10.0
libtpu: 0.0.40
codegen_flags: <defaults>
</compile_context>

<pallas_src>
import functools

import numpy as np
import jax
import jax.numpy as jnp
from jax.experimental import pallas as pl
from jax.experimental.pallas import tpu as pltpu


def _round_up(x, m):
    return ((x + m - 1) // m) * m


def _pad_to(a, shape):
    pads = [(0, s - d) for d, s in zip(a.shape, shape)]
    return jnp.pad(a, pads)


# ----------------------------------------------------------------------------
# Fused kernel: one RGCN layer per grid step; gather/pad fused at last step.
# ----------------------------------------------------------------------------
def _fused_rgcn_gather_kernel(a_ref, x_ref, w_ref, bias_ref, sel_ref,
                              o_ref, h_ref, msg_ref, *,
                              num_relations, n_row, h_pad):
    R, Nrow, Hp = num_relations, n_row, h_pad
    layer = pl.program_id(0)
    last = pl.num_programs(0) - 1

    # Initialize the persistent hidden state (rows >= Nrow stay zero forever).
    @pl.when(layer == 0)
    def _():
        h_ref[...] = x_ref[...]

    h = h_ref[...]                                    # (Np, Hp) bf16

    # (1) All per-relation messages in ONE stacked MXU pass:
    #     (R*Nrow, Np) @ (Np, Hp) -> (R*Nrow, Hp); row r*Nrow+i = (A_r @ h)[i].
    msg = jnp.dot(a_ref[...], h,
                  preferred_element_type=jnp.float32).astype(h_ref.dtype)

    # (2) Wide layout: relation r at lane offset r*Hp; h itself ("root"
    #     identity relation) in the last block.  Static slices -> vreg copies.
    for r in range(R):
        msg_ref[:, r * Hp:(r + 1) * Hp] = msg[r * Nrow:(r + 1) * Nrow, :]
    msg_ref[:, R * Hp:(R + 1) * Hp] = h[0:Nrow, :]

    # (3) Relation reduction + root transform as ONE big-K matmul, f32 acc.
    acc = jnp.dot(msg_ref[...], w_ref[...], preferred_element_type=jnp.float32)
    acc = acc + bias_ref[...][0]                      # (1, Hp) f32 broadcast

    @pl.when(layer != last)
    def _():
        # ReLU (Dropout == identity) then re-quantize for the next layer.
        h_ref[0:Nrow, :] = jnp.maximum(acc, 0.0).astype(h_ref.dtype)

    @pl.when(layer == last)
    def _():
        h_ref[0:Nrow, :] = acc.astype(h_ref.dtype)
        # (4) Fused per-sample grouping + zero padding: gnn_embeds = S @ h.
        #     S is one-hot 0/1 -> exact selection even with bf16 operands.
        o_ref[...] = jnp.dot(sel_ref[...], h_ref[...],
                             preferred_element_type=jnp.float32)


@jax.jit
def conversation_graph_forward_fused(params, adj, x, sel):
    """Fused forward: RGCN stack + gather/pad in a single pallas_call.

    params : list of dicts with w_rel (R,H,H), w_root (H,H), bias (1,H)
    adj    : (R, N, N) normalized dense adjacency (A_r[i, j] = 1/|N_r(i)|)
    x      : (N, H) node features
    sel    : (B, M, N) one-hot selection matrix (per-sample node grouping)
    returns: (B, M, H) gnn_embeds
    """
    R, N, _ = adj.shape
    H = x.shape[1]
    L = len(params)
    B, Mmax, _ = sel.shape

    cd = jnp.bfloat16               # MXU operand dtype; accumulation is f32
    Nrow = _round_up(N, 16)         # node axis as MXU M rows (bf16 sublanes)
    Np = _round_up(N, 128)          # node axis as contraction / lane axis
    Hp = _round_up(H, 128)          # lane-dense hidden axis
    BM = B * Mmax
    BMp = _round_up(BM, 16)         # output rows (bf16-sublane aligned)

    # ---- host-side layout prep (zero padding + stacking, done once) ----
    a_flat = _pad_to(adj, (R, Nrow, Np)).reshape(R * Nrow, Np).astype(cd)
    x_pad = _pad_to(x, (Np, Hp)).astype(cd)
    w_layers = []
    for p in params:
        w_rel = _pad_to(p["w_rel"], (R, Hp, Hp)).reshape(R * Hp, Hp)
        w_root = _pad_to(p["w_root"], (Hp, Hp))
        w_layers.append(jnp.concatenate([w_rel, w_root], axis=0))
    w_all = jnp.concatenate(w_layers, axis=0).astype(cd)    # (L*(R+1)*Hp, Hp)
    bias_all = jnp.stack([_pad_to(p["bias"], (1, Hp)) for p in params],
                         axis=0)                             # (L, 1, Hp) f32
    sel_flat = _pad_to(sel.reshape(BM, N), (BMp, Np)).astype(cd)

    kernel = functools.partial(
        _fused_rgcn_gather_kernel,
        num_relations=R, n_row=Nrow, h_pad=Hp)

    out = pl.pallas_call(
        kernel,
        out_shape=jax.ShapeDtypeStruct((BMp, Hp), jnp.float32),
        grid_spec=pltpu.PrefetchScalarGridSpec(
            num_scalar_prefetch=0,
            grid=(L,),
            in_specs=[
                pl.BlockSpec((R * Nrow, Np), lambda l: (0, 0)),       # a_flat
                pl.BlockSpec((Np, Hp), lambda l: (0, 0)),             # x
                pl.BlockSpec(((R + 1) * Hp, Hp), lambda l: (l, 0)),   # weights (layer l)
                pl.BlockSpec((1, 1, Hp), lambda l: (l, 0, 0)),        # bias (layer l)
                pl.BlockSpec((BMp, Np), lambda l: (0, 0)),            # selection
            ],
            out_specs=pl.BlockSpec((BMp, Hp), lambda l: (0, 0)),
            scratch_shapes=[
                pltpu.VMEM((Np, Hp), cd),                 # persistent hidden h
                pltpu.VMEM((Nrow, (R + 1) * Hp), cd),     # wide message layout
            ]),
        compiler_params=pltpu.CompilerParams(
            dimension_semantics=("arbitrary",),
            vmem_limit_bytes=32 * 1024 * 1024),
    )(a_flat, x_pad, w_all, bias_all, sel_flat)

    return out[:BM, :H].reshape(B, Mmax, H)


# ----------------------------------------------------------------------------
# Model glue (plain JAX / numpy preprocessing).
# ----------------------------------------------------------------------------
def build_normalized_adjacency(edge_index, edge_type, num_nodes, num_relations):
    """Dense per-relation adjacency with mean normalization (PyG RGCNConv)."""
    src = edge_index[0]
    dst = edge_index[1]
    A = jnp.zeros((num_relations, num_nodes, num_nodes), jnp.float32)
    A = A.at[edge_type, dst, src].add(1.0)
    deg = A.sum(axis=2, keepdims=True)              # |N_r(i)|
    A = A / jnp.maximum(deg, 1.0)
    return A


def build_selection_matrix(node_to_graph, batch_size):
    """One-hot selection S[b, k, j]: k-th node of graph b is global node j.

    Host-side numpy preprocessing (max_nodes is data-dependent), matching the
    PyTorch forward's python loop; not part of the jitted kernel path.
    """
    n2g = np.asarray(node_to_graph)
    N = n2g.shape[0]
    per_sample = [np.where(n2g == b)[0] for b in range(batch_size)]
    max_nodes = max(len(idxs) for idxs in per_sample)
    S = np.zeros((batch_size, max_nodes, N), np.float32)
    for b, idxs in enumerate(per_sample):
        for k, j in enumerate(idxs):
            S[b, k, j] = 1.0
    return jnp.asarray(S)


def init_graph_model_params(key, hidden_size, num_relations, num_layers=3):
    params = []
    for _ in range(num_layers):
        key, k1, k2, k3 = jax.random.split(key, 4)
        scale = 1.0 / np.sqrt(hidden_size)
        params.append(dict(
            w_rel=jax.random.normal(
                k1, (num_relations, hidden_size, hidden_size),
                jnp.float32) * scale,
            w_root=jax.random.normal(
                k2, (hidden_size, hidden_size), jnp.float32) * scale,
            bias=jax.random.normal(k3, (1, hidden_size), jnp.float32) * 0.01,
        ))
    return params


def conversation_summarization_forward(params, x, edge_index, edge_type,
                                       node_to_graph, batch_size,
                                       num_relations):
    N = x.shape[0]
    adj = build_normalized_adjacency(edge_index, edge_type, N, num_relations)
    sel = build_selection_matrix(node_to_graph, batch_size)
    gnn_embeds = conversation_graph_forward_fused(params, adj, x, sel)
    # TODO(synk): feed gnn_embeds into LLaMAWithIntermediateFusion (HF LLaMA
    # decoder with fusion layers) -- not representable here; gnn_embeds is the
    # returned result of the Pallas kernel.
    return gnn_embeds


# ----------------------------------------------------------------------------
# Pure-JAX reference mirroring the kernel's bf16 quantization points.
# ----------------------------------------------------------------------------
def reference_forward(params, x, adj, sel, compute_dtype=jnp.bfloat16):
    def q(v):
        return v.astype(compute_dtype).astype(jnp.float32)

    A = q(adj)
    h = q(x)
    num_layers = len(params)
    for idx, p in enumerate(params):
        w_rel = q(p["w_rel"])
        w_root = q(p["w_root"])
        msgs = q(jnp.einsum("rij,jc->ric", A, h))    # matches bf16 msg scratch
        out = h @ w_root + p["bias"] + jnp.einsum("ric,rcd->id", msgs, w_rel)
        if idx < num_layers - 1:
            out = jnp.maximum(out, 0.0)
        h = q(out)                                   # kernel re-quantizes h each layer
    return jnp.einsum("bmn,nh->bmh", q(sel), h)      # exact 0/1 selection


if __name__ == "__main__":
    key = jax.random.PRNGKey(0)

    # Small shapes consistent with the forward pass.
    hidden_size = 32          # stand-in for fused_model.config.hidden_size
    num_relations = 17
    num_layers = 3
    batch_size = 2
    num_nodes = 16
    num_edges = 40

    key, kx, ke1, ke2, ket = jax.random.split(key, 5)
    x = jax.random.normal(kx, (num_nodes, hidden_size), jnp.float32)
    edge_src = jax.random.randint(ke1, (num_edges,), 0, num_nodes)
    edge_dst = jax.random.randint(ke2, (num_edges,), 0, num_nodes)
    edge_index = jnp.stack([edge_src, edge_dst], axis=0)          # (2, E)
    edge_type = jax.random.randint(ket, (num_edges,), 0, num_relations)
    # First 9 nodes belong to sample 0, remaining 7 to sample 1.
    node_to_graph = jnp.concatenate(
        [jnp.zeros((9,), jnp.int32), jnp.ones((7,), jnp.int32)])

    params = init_graph_model_params(key, hidden_size, num_relations,
                                     num_layers)

    gnn_embeds = conversation_summarization_forward(
        params, x, edge_index, edge_type, node_to_graph,
        batch_size, num_relations)
    gnn_embeds = jax.block_until_ready(gnn_embeds)

    # Sanity check against a pure-JAX reference that applies the same bf16
    # operand quantization (accumulation is f32 in both). Tolerance absorbs
    # f32 summation-order differences and rare re-quantization boundary flips.
    adj = build_normalized_adjacency(edge_index, edge_type, num_nodes,
                                     num_relations)
    sel = build_selection_matrix(node_to_graph, batch_size)
    ref = reference_forward(params, x, adj, sel)
    np.testing.assert_allclose(np.asarray(gnn_embeds), np.asarray(ref),
                               rtol=2e-2, atol=2e-2)

    # Padded-row isolation: sample 1 has 7 real nodes; rows 7..8 of its
    # gnn_embeds are pure padding and must be exactly zero.
    np.testing.assert_array_equal(np.asarray(gnn_embeds)[1, 7:, :], 0.0)

    print("KERNEL_OK")
</pallas_src>

<mosaic_0001>
module attributes {stable_mosaic.version = 11 : i64} {
  func.func @_fused_rgcn_gather_kernel(%arg0: i32, %arg1: memref<272x128xbf16, #tpu.memory_space<vmem>>, %arg2: memref<128x128xbf16, #tpu.memory_space<vmem>>, %arg3: memref<2304x128xbf16, #tpu.memory_space<vmem>>, %arg4: memref<1x1x128xf32, #tpu.memory_space<vmem>>, %arg5: memref<32x128xbf16, #tpu.memory_space<vmem>>, %arg6: memref<32x128xf32, #tpu.memory_space<vmem>>, %arg7: memref<128x128xbf16, #tpu.memory_space<vmem>>, %arg8: memref<16x2304xbf16, #tpu.memory_space<vmem>>) attributes {dimension_semantics = [#tpu.dimension_semantics<arbitrary>], iteration_bounds = array<i64: 3>, scalar_prefetch = 0 : i64, scratch_operands = 2 : i64, tpu.core_type = #tpu.core_type<tc>, window_params = [{pipeline_mode = #tpu.pipeline_mode<synchronous>, transform_indices = @transform_0, window_bounds = array<i64: 272, 128>}, {pipeline_mode = #tpu.pipeline_mode<synchronous>, transform_indices = @transform_1, window_bounds = array<i64: 128, 128>}, {transform_indices = @transform_2, window_bounds = array<i64: 2304, 128>}, {transform_indices = @transform_3, window_bounds = array<i64: 1, 1, 128>}, {pipeline_mode = #tpu.pipeline_mode<synchronous>, transform_indices = @transform_4, window_bounds = array<i64: 32, 128>}, {pipeline_mode = #tpu.pipeline_mode<synchronous>, transform_indices = @transform_5, window_bounds = array<i64: 32, 128>}]} {
    %c0_i32 = arith.constant 0 : i32
    %0 = arith.cmpi eq, %arg0, %c0_i32 : i32
    %1 = arith.extui %0 : i1 to i32
    %c0_i32_0 = arith.constant 0 : i32
    %2 = arith.cmpi ne, %1, %c0_i32_0 : i32
    scf.if %2 {
      %c0_34 = arith.constant 0 : index
      %c0_35 = arith.constant 0 : index
      %56 = vector.load %arg2[%c0_34, %c0_35] : memref<128x128xbf16, #tpu.memory_space<vmem>>, vector<128x128xbf16>
      %c0_36 = arith.constant 0 : index
      %c0_37 = arith.constant 0 : index
      %57 = vector.load %arg7[%c0_36, %c0_37] : memref<128x128xbf16, #tpu.memory_space<vmem>>, vector<128x128xbf16>
      tpu.vector_store %arg7[%c0_36, %c0_37], %56 {strides = array<i32>} : memref<128x128xbf16, #tpu.memory_space<vmem>>, vector<128x128xbf16>,
    } else {
    }
    %c0 = arith.constant 0 : index
    %c0_1 = arith.constant 0 : index
    %3 = vector.load %arg7[%c0, %c0_1] : memref<128x128xbf16, #tpu.memory_space<vmem>>, vector<128x128xbf16>
    %c0_2 = arith.constant 0 : index
    %c0_3 = arith.constant 0 : index
    %4 = vector.load %arg1[%c0_2, %c0_3] : memref<272x128xbf16, #tpu.memory_space<vmem>>, vector<272x128xbf16>
    %cst = arith.constant dense<0.000000e+00> : vector<272x128xf32>
    %5 = tpu.matmul %4, %3, %cst {dimension_numbers = #tpu.dot_dimension_numbers<[1], [0], [0], [1], [0, 0, 1, 1], [], []>} : vector<272x128xbf16>, vector<128x128xbf16>, vector<272x128xf32> -> vector<272x128xf32>
    %6 = arith.truncf %5 : vector<272x128xf32> to vector<272x128xbf16>
    %7 = vector.extract_strided_slice %6 {offsets = [0, 0], sizes = [16, 128], strides = [1, 1]} : vector<272x128xbf16> to vector<16x128xbf16>
    %c0_4 = arith.constant 0 : index
    %c0_5 = arith.constant 0 : index
    %8 = vector.load %arg8[%c0_4, %c0_5] : memref<16x2304xbf16, #tpu.memory_space<vmem>>, vector<16x128xbf16>
    tpu.vector_store %arg8[%c0_4, %c0_5], %7 {strides = array<i32>} : memref<16x2304xbf16, #tpu.memory_space<vmem>>, vector<16x128xbf16>,
    %9 = vector.extract_strided_slice %6 {offsets = [16, 0], sizes = [16, 128], strides = [1, 1]} : vector<272x128xbf16> to vector<16x128xbf16>
    %c0_6 = arith.constant 0 : index
    %c128 = arith.constant 128 : index
    %10 = vector.load %arg8[%c0_6, %c128] : memref<16x2304xbf16, #tpu.memory_space<vmem>>, vector<16x128xbf16>
    tpu.vector_store %arg8[%c0_6, %c128], %9 {strides = array<i32>} : memref<16x2304xbf16, #tpu.memory_space<vmem>>, vector<16x128xbf16>,
    %11 = vector.extract_strided_slice %6 {offsets = [32, 0], sizes = [16, 128], strides = [1, 1]} : vector<272x128xbf16> to vector<16x128xbf16>
    %c0_7 = arith.constant 0 : index
    %c256 = arith.constant 256 : index
    %12 = vector.load %arg8[%c0_7, %c256] : memref<16x2304xbf16, #tpu.memory_space<vmem>>, vector<16x128xbf16>
    tpu.vector_store %arg8[%c0_7, %c256], %11 {strides = array<i32>} : memref<16x2304xbf16, #tpu.memory_space<vmem>>, vector<16x128xbf16>,
    %13 = vector.extract_strided_slice %6 {offsets = [48, 0], sizes = [16, 128], strides = [1, 1]} : vector<272x128xbf16> to vector<16x128xbf16>
    %c0_8 = arith.constant 0 : index
    %c384 = arith.constant 384 : index
    %14 = vector.load %arg8[%c0_8, %c384] : memref<16x2304xbf16, #tpu.memory_space<vmem>>, vector<16x128xbf16>
    tpu.vector_store %arg8[%c0_8, %c384], %13 {strides = array<i32>} : memref<16x2304xbf16, #tpu.memory_space<vmem>>, vector<16x128xbf16>,
    %15 = vector.extract_strided_slice %6 {offsets = [64, 0], sizes = [16, 128], strides = [1, 1]} : vector<272x128xbf16> to vector<16x128xbf16>
    %c0_9 = arith.constant 0 : index
    %c512 = arith.constant 512 : index
    %16 = vector.load %arg8[%c0_9, %c512] : memref<16x2304xbf16, #tpu.memory_space<vmem>>, vector<16x128xbf16>
    tpu.vector_store %arg8[%c0_9, %c512], %15 {strides = array<i32>} : memref<16x2304xbf16, #tpu.memory_space<vmem>>, vector<16x128xbf16>,
    %17 = vector.extract_strided_slice %6 {offsets = [80, 0], sizes = [16, 128], strides = [1, 1]} : vector<272x128xbf16> to vector<16x128xbf16>
    %c0_10 = arith.constant 0 : index
    %c640 = arith.constant 640 : index
    %18 = vector.load %arg8[%c0_10, %c640] : memref<16x2304xbf16, #tpu.memory_space<vmem>>, vector<16x128xbf16>
    tpu.vector_store %arg8[%c0_10, %c640], %17 {strides = array<i32>} : memref<16x2304xbf16, #tpu.memory_space<vmem>>, vector<16x128xbf16>,
    %19 = vector.extract_strided_slice %6 {offsets = [96, 0], sizes = [16, 128], strides = [1, 1]} : vector<272x128xbf16> to vector<16x128xbf16>
    %c0_11 = arith.constant 0 : index
    %c768 = arith.constant 768 : index
    %20 = vector.load %arg8[%c0_11, %c768] : memref<16x2304xbf16, #tpu.memory_space<vmem>>, vector<16x128xbf16>
    tpu.vector_store %arg8[%c0_11, %c768], %19 {strides = array<i32>} : memref<16x2304xbf16, #tpu.memory_space<vmem>>, vector<16x128xbf16>,
    %21 = vector.extract_strided_slice %6 {offsets = [112, 0], sizes = [16, 128], strides = [1, 1]} : vector<272x128xbf16> to vector<16x128xbf16>
    %c0_12 = arith.constant 0 : index
    %c896 = arith.constant 896 : index
    %22 = vector.load %arg8[%c0_12, %c896] : memref<16x2304xbf16, #tpu.memory_space<vmem>>, vector<16x128xbf16>
    tpu.vector_store %arg8[%c0_12, %c896], %21 {strides = array<i32>} : memref<16x2304xbf16, #tpu.memory_space<vmem>>, vector<16x128xbf16>,
    %23 = vector.extract_strided_slice %6 {offsets = [128, 0], sizes = [16, 128], strides = [1, 1]} : vector<272x128xbf16> to vector<16x128xbf16>
    %c0_13 = arith.constant 0 : index
    %c1024 = arith.constant 1024 : index
    %24 = vector.load %arg8[%c0_13, %c1024] : memref<16x2304xbf16, #tpu.memory_space<vmem>>, vector<16x128xbf16>
    tpu.vector_store %arg8[%c0_13, %c1024], %23 {strides = array<i32>} : memref<16x2304xbf16, #tpu.memory_space<vmem>>, vector<16x128xbf16>,
    %25 = vector.extract_strided_slice %6 {offsets = [144, 0], sizes = [16, 128], strides = [1, 1]} : vector<272x128xbf16> to vector<16x128xbf16>
    %c0_14 = arith.constant 0 : index
    %c1152 = arith.constant 1152 : index
    %26 = vector.load %arg8[%c0_14, %c1152] : memref<16x2304xbf16, #tpu.memory_space<vmem>>, vector<16x128xbf16>
    tpu.vector_store %arg8[%c0_14, %c1152], %25 {strides = array<i32>} : memref<16x2304xbf16, #tpu.memory_space<vmem>>, vector<16x128xbf16>,
    %27 = vector.extract_strided_slice %6 {offsets = [160, 0], sizes = [16, 128], strides = [1, 1]} : vector<272x128xbf16> to vector<16x128xbf16>
    %c0_15 = arith.constant 0 : index
    %c1280 = arith.constant 1280 : index
    %28 = vector.load %arg8[%c0_15, %c1280] : memref<16x2304xbf16, #tpu.memory_space<vmem>>, vector<16x128xbf16>
    tpu.vector_store %arg8[%c0_15, %c1280], %27 {strides = array<i32>} : memref<16x2304xbf16, #tpu.memory_space<vmem>>, vector<16x128xbf16>,
    %29 = vector.extract_strided_slice %6 {offsets = [176, 0], sizes = [16, 128], strides = [1, 1]} : vector<272x128xbf16> to vector<16x128xbf16>
    %c0_16 = arith.constant 0 : index
    %c1408 = arith.constant 1408 : index
    %30 = vector.load %arg8[%c0_16, %c1408] : memref<16x2304xbf16, #tpu.memory_space<vmem>>, vector<16x128xbf16>
    tpu.vector_store %arg8[%c0_16, %c1408], %29 {strides = array<i32>} : memref<16x2304xbf16, #tpu.memory_space<vmem>>, vector<16x128xbf16>,
    %31 = vector.extract_strided_slice %6 {offsets = [192, 0], sizes = [16, 128], strides = [1, 1]} : vector<272x128xbf16> to vector<16x128xbf16>
    %c0_17 = arith.constant 0 : index
    %c1536 = arith.constant 1536 : index
    %32 = vector.load %arg8[%c0_17, %c1536] : memref<16x2304xbf16, #tpu.memory_space<vmem>>, vector<16x128xbf16>
    tpu.vector_store %arg8[%c0_17, %c1536], %31 {strides = array<i32>} : memref<16x2304xbf16, #tpu.memory_space<vmem>>, vector<16x128xbf16>,
    %33 = vector.extract_strided_slice %6 {offsets = [208, 0], sizes = [16, 128], strides = [1, 1]} : vector<272x128xbf16> to vector<16x128xbf16>
    %c0_18 = arith.constant 0 : index
    %c1664 = arith.constant 1664 : index
    %34 = vector.load %arg8[%c0_18, %c1664] : memref<16x2304xbf16, #tpu.memory_space<vmem>>, vector<16x128xbf16>
    tpu.vector_store %arg8[%c0_18, %c1664], %33 {strides = array<i32>} : memref<16x2304xbf16, #tpu.memory_space<vmem>>, vector<16x128xbf16>,
    %35 = vector.extract_strided_slice %6 {offsets = [224, 0], sizes = [16, 128], strides = [1, 1]} : vector<272x128xbf16> to vector<16x128xbf16>
    %c0_19 = arith.constant 0 : index
    %c1792 = arith.constant 1792 : index
    %36 = vector.load %arg8[%c0_19, %c1792] : memref<16x2304xbf16, #tpu.memory_space<vmem>>, vector<16x128xbf16>
    tpu.vector_store %arg8[%c0_19, %c1792], %35 {strides = array<i32>} : memref<16x2304xbf16, #tpu.memory_space<vmem>>, vector<16x128xbf16>,
    %37 = vector.extract_strided_slice %6 {offsets = [240, 0], sizes = [16, 128], strides = [1, 1]} : vector<272x128xbf16> to vector<16x128xbf16>
    %c0_20 = arith.constant 0 : index
    %c1920 = arith.constant 1920 : index
    %38 = vector.load %arg8[%c0_20, %c1920] : memref<16x2304xbf16, #tpu.memory_space<vmem>>, vector<16x128xbf16>
    tpu.vector_store %arg8[%c0_20, %c1920], %37 {strides = array<i32>} : memref<16x2304xbf16, #tpu.memory_space<vmem>>, vector<16x128xbf16>,
    %39 = vector.extract_strided_slice %6 {offsets = [256, 0], sizes = [16, 128], strides = [1, 1]} : vector<272x128xbf16> to vector<16x128xbf16>
    %c0_21 = arith.constant 0 : index
    %c2048 = arith.constant 2048 : index
    %40 = vector.load %arg8[%c0_21, %c2048] : memref<16x2304xbf16, #tpu.memory_space<vmem>>, vector<16x128xbf16>
    tpu.vector_store %arg8[%c0_21, %c2048], %39 {strides = array<i32>} : memref<16x2304xbf16, #tpu.memory_space<vmem>>, vector<16x128xbf16>,
    %41 = vector.extract_strided_slice %3 {offsets = [0, 0], sizes = [16, 128], strides = [1, 1]} : vector<128x128xbf16> to vector<16x128xbf16>
    %c0_22 = arith.constant 0 : index
    %c2176 = arith.constant 2176 : index
    %42 = vector.load %arg8[%c0_22, %c2176] : memref<16x2304xbf16, #tpu.memory_space<vmem>>, vector<16x128xbf16>
    tpu.vector_store %arg8[%c0_22, %c2176], %41 {strides = array<i32>} : memref<16x2304xbf16, #tpu.memory_space<vmem>>, vector<16x128xbf16>,
    %c0_23 = arith.constant 0 : index
    %c0_24 = arith.constant 0 : index
    %43 = vector.load %arg8[%c0_23, %c0_24] : memref<16x2304xbf16, #tpu.memory_space<vmem>>, vector<16x2304xbf16>
    %c0_25 = arith.constant 0 : index
    %c0_26 = arith.constant 0 : index
    %44 = vector.load %arg3[%c0_25, %c0_26] : memref<2304x128xbf16, #tpu.memory_space<vmem>>, vector<2304x128xbf16>
    %cst_27 = arith.constant dense<0.000000e+00> : vector<16x128xf32>
    %45 = tpu.matmul %43, %44, %cst_27 {dimension_numbers = #tpu.dot_dimension_numbers<[1], [0], [0], [1], [0, 0, 1, 1], [], []>} : vector<16x2304xbf16>, vector<2304x128xbf16>, vector<16x128xf32> -> vector<16x128xf32>
    %c0_28 = arith.constant 0 : index
    %c0_29 = arith.constant 0 : index
    %c0_30 = arith.constant 0 : index
    %46 = vector.load %arg4[%c0_28, %c0_29, %c0_30] : memref<1x1x128xf32, #tpu.memory_space<vmem>>, vector<1x1x128xf32>
    %47 = vector.shape_cast %46 : vector<1x1x128xf32> to vector<1x128xf32>
    %48 = vector.broadcast %47 : vector<1x128xf32> to vector<16x128xf32>
    %49 = arith.addf %45, %48 : vector<16x128xf32>
    %c2_i32 = arith.constant 2 : i32
    %50 = arith.cmpi ne, %arg0, %c2_i32 : i32
    %51 = arith.extui %50 : i1 to i32
    %c0_i32_31 = arith.constant 0 : i32
    %52 = arith.cmpi ne, %51, %c0_i32_31 : i32
    scf.if %52 {
      %cst_34 = arith.constant 0.000000e+00 : f32
      %56 = vector.broadcast %cst_34 : f32 to vector<16x128xf32>
      %57 = arith.maximumf %49, %56 : vector<16x128xf32>
      %58 = arith.truncf %57 : vector<16x128xf32> to vector<16x128xbf16>
      %c0_35 = arith.constant 0 : index
      %c0_36 = arith.constant 0 : index
      %59 = vector.load %arg7[%c0_35, %c0_36] : memref<128x128xbf16, #tpu.memory_space<vmem>>, vector<16x128xbf16>
      tpu.vector_store %arg7[%c0_35, %c0_36], %58 {strides = array<i32>} : memref<128x128xbf16, #tpu.memory_space<vmem>>, vector<16x128xbf16>,
    } else {
    }
    %c2_i32_32 = arith.constant 2 : i32
    %53 = arith.cmpi eq, %arg0, %c2_i32_32 : i32
    %54 = arith.extui %53 : i1 to i32
    %c0_i32_33 = arith.constant 0 : i32
    %55 = arith.cmpi ne, %54, %c0_i32_33 : i32
    scf.if %55 {
      %56 = arith.truncf %49 : vector<16x128xf32> to vector<16x128xbf16>
      %c0_34 = arith.constant 0 : index
      %c0_35 = arith.constant 0 : index
      %57 = vector.load %arg7[%c0_34, %c0_35] : memref<128x128xbf16, #tpu.memory_space<vmem>>, vector<16x128xbf16>
      tpu.vector_store %arg7[%c0_34, %c0_35], %56 {strides = array<i32>} : memref<128x128xbf16, #tpu.memory_space<vmem>>, vector<16x128xbf16>,
      %c0_36 = arith.constant 0 : index
      %c0_37 = arith.constant 0 : index
      %58 = vector.load %arg5[%c0_36, %c0_37] : memref<32x128xbf16, #tpu.memory_space<vmem>>, vector<32x128xbf16>
      %c0_38 = arith.constant 0 : index
      %c0_39 = arith.constant 0 : index
      %59 = vector.load %arg7[%c0_38, %c0_39] : memref<128x128xbf16, #tpu.memory_space<vmem>>, vector<128x128xbf16>
      %cst_40 = arith.constant dense<0.000000e+00> : vector<32x128xf32>
      %60 = tpu.matmul %58, %59, %cst_40 {dimension_numbers = #tpu.dot_dimension_numbers<[1], [0], [0], [1], [0, 0, 1, 1], [], []>} : vector<32x128xbf16>, vector<128x128xbf16>, vector<32x128xf32> -> vector<32x128xf32>
      %c0_41 = arith.constant 0 : index
      %c0_42 = arith.constant 0 : index
      %61 = vector.load %arg6[%c0_41, %c0_42] : memref<32x128xf32, #tpu.memory_space<vmem>>, vector<32x128xf32>
      tpu.vector_store %arg6[%c0_41, %c0_42], %60 {strides = array<i32>} : memref<32x128xf32, #tpu.memory_space<vmem>>, vector<32x128xf32>,
    } else {
    }
    return
  }
  func.func @transform_0(%arg0: i32) -> (i32, i32) {
    %c0_i32 = arith.constant 0 : i32
    %c0_i32_0 = arith.constant 0 : i32
    %c0_i32_1 = arith.constant 0 : i32
    return %c0_i32, %c0_i32_0 : i32, i32
  }
  func.func @transform_1(%arg0: i32) -> (i32, i32) {
    %c0_i32 = arith.constant 0 : i32
    %c0_i32_0 = arith.constant 0 : i32
    %c0_i32_1 = arith.constant 0 : i32
    return %c0_i32, %c0_i32_0 : i32, i32
  }
  func.func @transform_2(%arg0: i32) -> (i32, i32) {
    %c0_i32 = arith.constant 0 : i32
    %c0_i32_0 = arith.constant 0 : i32
    return %arg0, %c0_i32 : i32, i32
  }
  func.func @transform_3(%arg0: i32) -> (i32, i32, i32) {
    %c0_i32 = arith.constant 0 : i32
    %c0_i32_0 = arith.constant 0 : i32
    %c0_i32_1 = arith.constant 0 : i32
    return %arg0, %c0_i32, %c0_i32_0 : i32, i32, i32
  }
  func.func @transform_4(%arg0: i32) -> (i32, i32) {
    %c0_i32 = arith.constant 0 : i32
    %c0_i32_0 = arith.constant 0 : i32
    %c0_i32_1 = arith.constant 0 : i32
    return %c0_i32, %c0_i32_0 : i32, i32
  }
  func.func @transform_5(%arg0: i32) -> (i32, i32) {
    %c0_i32 = arith.constant 0 : i32
    %c0_i32_0 = arith.constant 0 : i32
    %c0_i32_1 = arith.constant 0 : i32
    return %c0_i32, %c0_i32_0 : i32, i32
  }
}

</mosaic_0001>

<bundles_post_ra>
// kernel: conversation_graph_forward_fused.1
= control target key start
LH: loop header
LB: loop body
LE: loop exit
PB: predicated region body
PF: predicated region fallthrough
CT: control target
= control target key end

     0   :  { %s3471_s18 = smov 0   ;;  %s3749_s0 = inlined_call_operand.vmem [shape: bf16[272,128], index: 0, kind: input, shape index: {}]   ;;  %s3750_s1 = inlined_call_operand.vmem [shape: bf16[128,128], index: 1, kind: input, shape index: {}]   ;;  %s3751_s2 = inlined_call_operand.vmem [shape: bf16[6912,128], index: 2, kind: input, shape index: {}]   ;;  %s3752_s3 = inlined_call_operand.vmem [shape: f32[3,1,128], index: 3, kind: input, shape index: {}]   ;;  %s3753_s4 = inlined_call_operand.vmem [shape: bf16[32,128], index: 4, kind: input, shape index: {}]   ;;  %s3754_s5 = inlined_call_operand.vmem [shape: f32[32,128], index: 5, kind: output, shape index: {}]  }
   0x1 LB: > { %s3477_s19 = sadd.s32 4294967295, %s3439_s18   ;;  %p2303_p0 = scmp.ge.s32.totalorder %s3439_s18, 1  ;;  %s3439_s18 = sphi %s3471_s18, %s15_s18  }
   0x2   : > { %p191_p1 = scmp.lt.s32.totalorder %s3439_s18, 4 }
   0x4   : > { %p192_p2 = pnand %p2303_p0, %p191_p1 }
   0x5   : > { %s217_s20 = smul.u32 (!%p192_p2), 288, %s3477_s19  ;;  %p223_p3 = scmp.lt.s32.totalorder (!%p192_p2), %s3477_s19, 2 }
   0x6   : > { %195 = sbr.rel (%p192_p2) target bundleno = 742 (0x2e6), region = 40  ;;  %p2305_p5 = scmp.ne.s32.totalorder (!%p192_p2), %s3477_s19, 0 }
   0x7   : > { %p218_p4 = scmp.lt.s32.totalorder (!%p192_p2), %s217_s20, 863 }
   0xb   : > { %s3484_s21 = scalar_select %p223_p3, %s3477_s19, 2 }
   0xc   : > { %s3756_s20 = smov (!%p218_p4, %s217_s20), 863  ;;  %229 = sbr.rel (%p2305_p5) target bundleno = 26 (0x1a), region = 44 }
   0xd   : > { %s225_s24 = scalar_lea.vmem %s3752_s3, %s3484_s21  ;;  %s2304_s25 = sshll.u32 %s3756_s20, 2 }
   0xe   : > { %s3493_s28 = scalar_lea.vmem %s3751_s2, %s2304_s25 }
  0x11   : > { %v230_v0 = vld [vmem:[%s3750_s1] sm:$0xff]   ;;  %v232_v1 = vld [vmem:[%s3750_s1 + $0x8] sm:$0xff]   ;;  %v234_v2 = vld [vmem:[%s3750_s1 + $0x10] sm:$0xff]  }
  0x12   : > { %246 = vst [vmem:[#allocation2] sm:$0xff] %v230_v0   ;;  %v236_v3 = vld [vmem:[%s3750_s1 + $0x18] sm:$0xff]   ;;  %v238_v4 = vld [vmem:[%s3750_s1 + $0x20] sm:$0xff]   ;;  %v240_v5 = vld [vmem:[%s3750_s1 + $0x28] sm:$0xff]  }
  0x13   : > { %248 = vst [vmem:[#allocation2 + $0x8] sm:$0xff] %v232_v1   ;;  %v242_v6 = vld [vmem:[%s3750_s1 + $0x30] sm:$0xff]   ;;  %v244_v7 = vld [vmem:[%s3750_s1 + $0x38] sm:$0xff]  }
  0x14   : > { %250 = vst [vmem:[#allocation2 + $0x10] sm:$0xff] %v234_v2  }
  0x15   : > { %252 = vst [vmem:[#allocation2 + $0x18] sm:$0xff] %v236_v3  }
  0x16   : > { %254 = vst [vmem:[#allocation2 + $0x20] sm:$0xff] %v238_v4  }
  0x17   : > { %256 = vst [vmem:[#allocation2 + $0x28] sm:$0xff] %v240_v5  }
  0x18   : > { %258 = vst [vmem:[#allocation2 + $0x30] sm:$0xff] %v242_v6  }
  0x19   : > { %260 = vst [vmem:[#allocation2 + $0x38] sm:$0xff] %v244_v7  }
  0x1a PF: > { %v3099_v14 = vld [vmem:[#allocation2 + $0x8] sm:$0xff]  ;;  %v3098_v15 = vld [vmem:[#allocation2] sm:$0xff]  ;;  %v3108_v18 = vld [vmem:[%s3749_s0 + $0x10] sm:$0xff]  ;;  %p3054_p6 = scmp.eq.s32.totalorder %s3477_s19, 2 }
  0x1b   : > { %v3100_v13 = vld [vmem:[#allocation2 + $0x10] sm:$0xff]  ;;  %v3106_v16 = vld [vmem:[%s3749_s0] sm:$0xff]  ;;  %v3107_v17 = vld [vmem:[%s3749_s0 + $0x8] sm:$0xff] }
  0x1c   : > { %v3101_v12 = vld [vmem:[#allocation2 + $0x18] sm:$0xff]  ;;  %v3110_v20 = vld [vmem:[%s3749_s0 + $0x20] sm:$0xff]  ;;  %v3111_v21 = vld [vmem:[%s3749_s0 + $0x28] sm:$0xff] }
  0x1d   : > { %v3102_v11 = vld [vmem:[#allocation2 + $0x20] sm:$0xff]  ;;  %v3109_v19 = vld [vmem:[%s3749_s0 + $0x18] sm:$0xff]  ;;  %v3112_v22 = vld [vmem:[%s3749_s0 + $0x30] sm:$0xff] }
  0x1e   : > { %v3103_v10 = vld [vmem:[#allocation2 + $0x28] sm:$0xff]  ;;  %v3121_v24 = vld [vmem:[%s3749_s0 + $0x78] sm:$0xff]  ;;  %v3147_v27 = vld [vmem:[%s3493_s28 + $0x30] sm:$0xff] }
  0x1f   : > { %v3104_v9 = vld [vmem:[#allocation2 + $0x30] sm:$0xff]  ;;  %v3119_v23 = vld [vmem:[%s3749_s0 + $0x68] sm:$0xff]  ;;  %v3148_v25 = vld [vmem:[%s3493_s28 + $0x38] sm:$0xff] }
  0x20   : > { %v3105_v8 = vld [vmem:[#allocation2 + $0x38] sm:$0xff]  ;;  %v3155_v28 = vld [vmem:[%s3493_s28 + $0x70] sm:$0xff]  ;;  %v3146_v29 = vld [vmem:[%s3493_s28 + $0x28] sm:$0xff] }
  0x21   : > { %462 = vmatpush.bf16.msra.mxu0 %v3105_v8  ;;  %3400 = vmatpush.bf16.msra.mxu1 %v3105_v8  ;;  %v3156_v26 = vld [vmem:[%s3493_s28 + $0x78] sm:$0xff]  ;;  %v3154_v30 = vld [vmem:[%s3493_s28 + $0x68] sm:$0xff]  ;;  %v3145_v32 = vld [vmem:[%s3493_s28 + $0x20] sm:$0xff] }
  0x22   : > { %3401 = vmatpush.bf16.msra.mxu2 %v3105_v8  ;;  %v3113_v31 = vld [vmem:[%s3749_s0 + $0x38] sm:$0xff]  ;;  %v3153_v33 = vld [vmem:[%s3493_s28 + $0x60] sm:$0xff]  ;;  %v3120_v34 = vld [vmem:[%s3749_s0 + $0x70] sm:$0xff] }
  0x23   : > { %v3122_v35 = vld [vmem:[%s3749_s0 + $0x80] sm:$0xff]  ;;  %v3144_v36 = vld [vmem:[%s3493_s28 + $0x18] sm:$0xff]  ;;  %v3143_v38 = vld [vmem:[%s3493_s28 + $0x10] sm:$0xff] }
  0x24   : > { %v3152_v37 = vld [vmem:[%s3493_s28 + $0x58] sm:$0xff]  ;;  %v3151_v39 = vld [vmem:[%s3493_s28 + $0x50] sm:$0xff]  ;;  %v3142_v40 = vld [vmem:[%s3493_s28 + $0x8] sm:$0xff] }
  0x25   : > { %463 = vmatpush.bf16.msra.mxu0 %v3104_v9  ;;  %3402 = vmatpush.bf16.msra.mxu1 %v3104_v9  ;;  %v3150_v41 = vld [vmem:[%s3493_s28 + $0x48] sm:$0xff]  ;;  %v3114_v42 = vld [vmem:[%s3749_s0 + $0x40] sm:$0xff]  ;;  %v3164_v46 = vld [vmem:[%s3493_s28 + $0xb8] sm:$0xff] }
  0x26   : > { %3403 = vmatpush.bf16.msra.mxu2 %v3104_v9  ;;  %v3141_v44 = vld [vmem:[%s3493_s28] sm:$0xff]  ;;  %v3172_v47 = vld [vmem:[%s3493_s28 + $0xf8] sm:$0xff]  ;;  %1918 = vmatpush.bf16.msra.mxu3 %v3164_v46  ;;  %v3163_v49 = vld [vmem:[%s3493_s28 + $0xb0] sm:$0xff] }
  0x27   : > { %v3149_v45 = vld [vmem:[%s3493_s28 + $0x40] sm:$0xff]  ;;  %v3171_v50 = vld [vmem:[%s3493_s28 + $0xf0] sm:$0xff]  ;;  %v3162_v51 = vld [vmem:[%s3493_s28 + $0xa8] sm:$0xff] }
  0x28   : > { %v3170_v52 = vld [vmem:[%s3493_s28 + $0xe8] sm:$0xff]  ;;  %v3161_v55 = vld [vmem:[%s3493_s28 + $0xa0] sm:$0xff]  ;;  %v3160_v58 = vld [vmem:[%s3493_s28 + $0x98] sm:$0xff] }
  0x29   : > { %464 = vmatpush.bf16.msra.mxu0 %v3103_v10  ;;  %3404 = vmatpush.bf16.msra.mxu1 %v3103_v10  ;;  %v3115_v53 = vld [vmem:[%s3749_s0 + $0x48] sm:$0xff]  ;;  %v3169_v56 = vld [vmem:[%s3493_s28 + $0xe0] sm:$0xff]  ;;  %v3168_v59 = vld [vmem:[%s3493_s28 + $0xd8] sm:$0xff] }
  0x2a   : > { %3405 = vmatpush.bf16.msra.mxu2 %v3103_v10  ;;  %1919 = vmatpush.bf16.msra.mxu3 %v3163_v49  ;;  %v3159_v61 = vld [vmem:[%s3493_s28 + $0x90] sm:$0xff]  ;;  %v3158_v0 = vld [vmem:[%s3493_s28 + $0x88] sm:$0xff]  ;;  %v3157_v4 = vld [vmem:[%s3493_s28 + $0x80] sm:$0xff] }
  0x2b   : > { %v3167_v62 = vld [vmem:[%s3493_s28 + $0xd0] sm:$0xff]  ;;  %v3166_v1 = vld [vmem:[%s3493_s28 + $0xc8] sm:$0xff]  ;;  %v3165_v5 = vld [vmem:[%s3493_s28 + $0xc0] sm:$0xff] }
  0x2c   : > { %v3116_v2 = vld [vmem:[%s3749_s0 + $0x50] sm:$0xff]  ;;  %v3202_v49 = vld [vmem:[%s3493_s28 + $0x1e8] sm:$0xff] }
  0x2d   : > { %465 = vmatpush.bf16.msra.mxu0 %v3102_v11  ;;  %3406 = vmatpush.bf16.msra.mxu1 %v3102_v11  ;;  %v3203_v46 = vld [vmem:[%s3493_s28 + $0x1f0] sm:$0xff] }
  0x2e   : > { %3407 = vmatpush.bf16.msra.mxu2 %v3102_v11  ;;  %1920 = vmatpush.bf16.msra.mxu3 %v3162_v51  ;;  %v3193_v51 = vld [vmem:[%s3493_s28 + $0x1a0] sm:$0xff] }
  0x31   : > { %466 = vmatpush.bf16.msra.mxu0 %v3101_v12  ;;  %3408 = vmatpush.bf16.msra.mxu1 %v3101_v12 }
  0x32   : > { %3409 = vmatpush.bf16.msra.mxu2 %v3101_v12  ;;  %1921 = vmatpush.bf16.msra.mxu3 %v3161_v55  ;;  %v3180_v12 = vld [vmem:[%s3493_s28 + $0x138] sm:$0xff] }
  0x33   : > { %v3192_v55 = vld [vmem:[%s3493_s28 + $0x198] sm:$0xff] }
  0x35   : > { %467 = vmatpush.bf16.msra.mxu0 %v3100_v13  ;;  %3410 = vmatpush.bf16.msra.mxu1 %v3100_v13 }
  0x36   : > { %3411 = vmatpush.bf16.msra.mxu2 %v3100_v13  ;;  %1922 = vmatpush.bf16.msra.mxu3 %v3160_v58  ;;  %v3188_v13 = vld [vmem:[%s3493_s28 + $0x178] sm:$0xff] }
  0x39   : > { %468 = vmatpush.bf16.msra.mxu0 %v3099_v14  ;;  %3412 = vmatpush.bf16.msra.mxu1 %v3099_v14 }
  0x3a   : > { %3413 = vmatpush.bf16.msra.mxu2 %v3099_v14  ;;  %1923 = vmatpush.bf16.msra.mxu3 %v3159_v61 }
  0x3d   : > { %469 = vmatpush.bf16.msra.mxu0 %v3098_v15  ;;  %3414 = vmatpush.bf16.msra.mxu1 %v3098_v15 }
  0x3e   : > { %3415 = vmatpush.bf16.msra.mxu2 %v3098_v15  ;;  %1924 = vmatpush.bf16.msra.mxu3 %v3158_v0  ;;  %v3179_v15 = vld [vmem:[%s3493_s28 + $0x130] sm:$0xff]  ;;  %v3198_v0 = vld [vmem:[%s3493_s28 + $0x1c8] sm:$0xff] }
  0x40   : > { %470 = vmatmul.bf16.vlgmr.msra.gmra.mxu0 %v3106_v16  ;;  %535 = vmatmul.bf16.vlgmr.msra.gmra.mxu1 %v3119_v23  ;;  %v3187_v16 = vld [vmem:[%s3493_s28 + $0x170] sm:$0xff] }
  0x41   : > { %545 = vmatmul.bf16.vlgmr.msra.gmra.mxu2 %v3121_v24  ;;  %1890 = vmatpush.bf16.msrb.mxu1 %v3148_v25  ;;  %v3176_v24 = vld [vmem:[%s3493_s28 + $0x118] sm:$0xff] }
  0x42   : > { %1904 = vmatpush.bf16.msrb.mxu2 %v3156_v26  ;;  %1925 = vmatpush.bf16.msra.mxu3 %v3157_v4  ;;  %v3184_v25 = vld [vmem:[%s3493_s28 + $0x158] sm:$0xff]  ;;  %v3197_v4 = vld [vmem:[%s3493_s28 + $0x1c0] sm:$0xff] }
  0x45   : > { %1891 = vmatpush.bf16.msrb.mxu1 %v3147_v27  ;;  %v3175_v27 = vld [vmem:[%s3493_s28 + $0x110] sm:$0xff] }
  0x46   : > { %1905 = vmatpush.bf16.msrb.mxu2 %v3155_v28  ;;  %1960 = vmatpush.bf16.msrb.mxu3 %v3188_v13  ;;  %v3183_v28 = vld [vmem:[%s3493_s28 + $0x150] sm:$0xff]  ;;  %v3220_v13 = vld [vmem:[%s3493_s28 + $0x278] sm:$0xff] }
  0x49   : > { %1892 = vmatpush.bf16.msrb.mxu1 %v3146_v29 }
  0x4a   : > { %1906 = vmatpush.bf16.msrb.mxu2 %v3154_v30  ;;  %1961 = vmatpush.bf16.msrb.mxu3 %v3187_v16  ;;  %v3174_v30 = vld [vmem:[%s3493_s28 + $0x108] sm:$0xff] }
  0x4d   : > { %1893 = vmatpush.bf16.msrb.mxu1 %v3145_v32  ;;  %v3118_v32 = vld [vmem:[%s3749_s0 + $0x60] sm:$0xff] }
  0x4e   : > { %1907 = vmatpush.bf16.msrb.mxu2 %v3153_v33 }
  0x50   : > { %475 = vmatmul.bf16.gmra.mxu0 %v3107_v17  ;;  %540 = vmatmul.bf16.gmra.mxu1 %v3120_v34  ;;  %v3178_v17 = vld [vmem:[%s3493_s28 + $0x128] sm:$0xff]  ;;  %v3173_v34 = vld [vmem:[%s3493_s28 + $0x100] sm:$0xff] }
  0x51   : > { %550 = vmatmul.bf16.gmra.mxu2 %v3122_v35  ;;  %1894 = vmatpush.bf16.msrb.mxu1 %v3144_v36  ;;  %v3181_v35 = vld [vmem:[%s3493_s28 + $0x140] sm:$0xff] }
  0x52   : > { %1908 = vmatpush.bf16.msrb.mxu2 %v3152_v37 }
  0x55   : > { %1895 = vmatpush.bf16.msrb.mxu1 %v3143_v38 }
  0x56   : > { %1909 = vmatpush.bf16.msrb.mxu2 %v3151_v39 }
  0x59   : > { %1896 = vmatpush.bf16.msrb.mxu1 %v3142_v40 }
  0x5a   : > { %1910 = vmatpush.bf16.msrb.mxu2 %v3150_v41 }
  0x5d   : > { %1897 = vmatpush.bf16.msrb.mxu1 %v3141_v44 }
  0x5e   : > { %1911 = vmatpush.bf16.msrb.mxu2 %v3149_v45  ;;  %v3195_v45 = vld [vmem:[%s3493_s28 + $0x1b0] sm:$0xff] }
  0x60   : > { %480 = vmatmul.bf16.gmra.mxu0 %v3108_v18  ;;  %v3186_v18 = vld [vmem:[%s3493_s28 + $0x168] sm:$0xff] }
  0x61   : > { %1932 = vmatpush.bf16.msra.mxu1 %v3172_v47  ;;  %1962 = vmatpush.bf16.msrb.mxu3 %v3186_v18  ;;  %v3212_v47 = vld [vmem:[%s3493_s28 + $0x238] sm:$0xff]  ;;  %v3205_v18 = vld [vmem:[%s3493_s28 + $0x200] sm:$0xff] }
  0x62   : > { %1946 = vmatpush.bf16.msra.mxu2 %v3180_v12 }
  0x65   : > { %1933 = vmatpush.bf16.msra.mxu1 %v3171_v50 }
  0x66   : > { %1947 = vmatpush.bf16.msra.mxu2 %v3179_v15 }
  0x69   : > { %1934 = vmatpush.bf16.msra.mxu1 %v3170_v52  ;;  %v3201_v52 = vld [vmem:[%s3493_s28 + $0x1e0] sm:$0xff] }
  0x6a   : > { %1948 = vmatpush.bf16.msra.mxu2 %v3178_v17  ;;  %v3219_v17 = vld [vmem:[%s3493_s28 + $0x270] sm:$0xff] }
  0x6d   : > { %1935 = vmatpush.bf16.msra.mxu1 %v3169_v56  ;;  %v3200_v56 = vld [vmem:[%s3493_s28 + $0x1d8] sm:$0xff] }
  0x70   : > { %485 = vmatmul.bf16.gmra.mxu0 %v3109_v19  ;;  %v3117_v19 = vld [vmem:[%s3749_s0 + $0x58] sm:$0xff] }
  0x71   : > { %1936 = vmatpush.bf16.msra.mxu1 %v3168_v59  ;;  %v3191_v59 = vld [vmem:[%s3493_s28 + $0x190] sm:$0xff] }
  0x75   : > { %1937 = vmatpush.bf16.msra.mxu1 %v3167_v62  ;;  %v3209_v62 = vld [vmem:[%s3493_s28 + $0x220] sm:$0xff] }
  0x79   : > { %1938 = vmatpush.bf16.msra.mxu1 %v3166_v1  ;;  %v3208_v1 = vld [vmem:[%s3493_s28 + $0x218] sm:$0xff] }
  0x7d   : > { %1939 = vmatpush.bf16.msra.mxu1 %v3165_v5  ;;  %v3207_v5 = vld [vmem:[%s3493_s28 + $0x210] sm:$0xff] }
  0x80   : > { %490 = vmatmul.bf16.gmra.mxu0 %v3110_v20 }
  0x90   : > { %495 = vmatmul.bf16.gmra.mxu0 %v3111_v21  ;;  %v3177_v21 = vld [vmem:[%s3493_s28 + $0x120] sm:$0xff] }
  0x91   : > { %1949 = vmatpush.bf16.msra.mxu2 %v3177_v21 }
  0x95   : > { %1950 = vmatpush.bf16.msra.mxu2 %v3176_v24  ;;  %v3235_v24 = vld [vmem:[%s3493_s28 + $0x2f0] sm:$0xff] }
  0x99   : > { %1951 = vmatpush.bf16.msra.mxu2 %v3175_v27  ;;  %v3217_v27 = vld [vmem:[%s3493_s28 + $0x260] sm:$0xff] }
  0x9d   : > { %1952 = vmatpush.bf16.msra.mxu2 %v3174_v30  ;;  %v3226_v30 = vld [vmem:[%s3493_s28 + $0x2a8] sm:$0xff] }
  0xa0   : > { %500 = vmatmul.bf16.gmra.mxu0 %v3112_v22  ;;  %v3185_v22 = vld [vmem:[%s3493_s28 + $0x160] sm:$0xff] }
  0xa1   : > { %1963 = vmatpush.bf16.msrb.mxu3 %v3185_v22  ;;  %1953 = vmatpush.bf16.msra.mxu2 %v3173_v34  ;;  %v3218_v22 = vld [vmem:[%s3493_s28 + $0x268] sm:$0xff]  ;;  %v3225_v34 = vld [vmem:[%s3493_s28 + $0x2a0] sm:$0xff] }
  0xa5   : > { %1964 = vmatpush.bf16.msrb.mxu3 %v3184_v25 }
  0xa9   : > { %1965 = vmatpush.bf16.msrb.mxu3 %v3183_v28 }
  0xb0   : > { %505 = vmatmul.bf16.gmra.mxu0 %v3113_v31  ;;  %v3182_v31 = vld [vmem:[%s3493_s28 + $0x148] sm:$0xff] }
  0xb1   : > { %1966 = vmatpush.bf16.msrb.mxu3 %v3182_v31  ;;  %v3234_v31 = vld [vmem:[%s3493_s28 + $0x2e8] sm:$0xff] }
  0xb5   : > { %1967 = vmatpush.bf16.msrb.mxu3 %v3181_v35  ;;  %v3233_v35 = vld [vmem:[%s3493_s28 + $0x2e0] sm:$0xff] }
  0xbd   : > { %v471_v43 = vpop.f32.mrf.mxu0 }
  0xc0   : > { %510 = vmatmul.bf16.gmra.mxu0 %v3114_v42  ;;  %v3196_v42 = vld [vmem:[%s3493_s28 + $0x1b8] sm:$0xff] }
  0xc4   : > { %v546_v16 = vpop.f32.mrf.mxu2 }
  0xc5   : > { %v473_v48 = vpop.f32.mrf.mxu0 }
  0xcd   : > { %v476_v54 = vpop.f32.mrf.mxu0 }
  0xce   : > { %v3298_v57 = vpack.c.bf16 %v476_v54, %v471_v43  ;;  %v3204_v43 = vld [vmem:[%s3493_s28 + $0x1f8] sm:$0xff]  ;;  %v3211_v54 = vld [vmem:[%s3493_s28 + $0x230] sm:$0xff] }
  0xd0   : > { %3299 = vst [vmem:[#allocation3] sm:$0xff] %v3298_v57   ;;  %515 = vmatmul.bf16.gmra.mxu0 %v3115_v53  ;;  %v3210_v57 = vld [vmem:[%s3493_s28 + $0x228] sm:$0xff] }
  0xd5   : > { %v478_v60 = vpop.f32.mrf.mxu0 }
  0xd6   : > { %v3303_v63 = vpack.c.bf16 %v478_v60, %v473_v48  ;;  %v3194_v48 = vld [vmem:[%s3493_s28 + $0x1a8] sm:$0xff]  ;;  %v3199_v60 = vld [vmem:[%s3493_s28 + $0x1d0] sm:$0xff] }
  0xd7   : > { %v2408_v6 = vld [vmem:[#allocation3] sm:$0xf]  ;;  %v3123_v8 = vld [vmem:[#allocation3 + $0x4] sm:$0xf] }
  0xd8   : > { %3385 = vst [vmem:[#allocation3 + $0x48] sm:$0xff] %v3303_v63   ;;  %v3190_v63 = vld [vmem:[%s3493_s28 + $0x188] sm:$0xff] }
  0xdd   : > { %v481_v3 = vpop.f32.mrf.mxu0 }
  0xdf   : > { %v3132_v7 = vld [vmem:[#allocation3 + $0x44] sm:$0xf0]  ;;  %v2410_v9 = vld [vmem:[#allocation3 + $0x48] sm:$0xf0] }
  0xe0   : > { %520 = vmatmul.bf16.gmra.mxu0 %v3116_v2  ;;  %v2409_v10 = vor.u32 %v3132_v7, %v2408_v6  ;;  %v2413_v11 = vor.u32 %v3123_v8, %v2410_v9 }
  0xe2   : > { %1898 = vmatmul.bf16.vlgmr.msrb.gmra.mxu1 %v2409_v10  ;;  %1912 = vmatmul.bf16.vlgmr.msrb.gmra.mxu2 %v2413_v11  ;;  %v3641_v10 = vpop.f32.mrf.mxu1 }
  0xe3   : > { %1974 = vmatpush.bf16.msrb.mxu1 %v3196_v42  ;;  %1988 = vmatpush.bf16.msrb.mxu2 %v3204_v43 }
  0xe5   : > { %v483_v14 = vpop.f32.mrf.mxu0 }
  0xe7   : > { %1975 = vmatpush.bf16.msrb.mxu1 %v3195_v45  ;;  %1989 = vmatpush.bf16.msrb.mxu2 %v3203_v46  ;;  %v3214_v45 = vld [vmem:[%s3493_s28 + $0x248] sm:$0xff]  ;;  %v3223_v46 = vld [vmem:[%s3493_s28 + $0x290] sm:$0xff] }
  0xea   : > { %v3649_v21 = vpop.f32.mrf.mxu1 }
  0xeb   : > { %1976 = vmatpush.bf16.msrb.mxu1 %v3194_v48  ;;  %1990 = vmatpush.bf16.msrb.mxu2 %v3202_v49 }
  0xed   : > { %v486_v20 = vpop.f32.mrf.mxu0 }
  0xee   : > { %v3308_v23 = vpack.c.bf16 %v486_v20, %v481_v3  ;;  %v3189_v3 = vld [vmem:[%s3493_s28 + $0x180] sm:$0xff]  ;;  %v3236_v20 = vld [vmem:[%s3493_s28 + $0x2f8] sm:$0xff] }
  0xef   : > { %1977 = vmatpush.bf16.msrb.mxu1 %v3193_v51  ;;  %1991 = vmatpush.bf16.msrb.mxu2 %v3201_v52 }
  0xf0   : > { %3386 = vst [vmem:[#allocation3 + $0x8] sm:$0xff] %v3308_v23   ;;  %525 = vmatmul.bf16.gmra.mxu0 %v3117_v19  ;;  %v3228_v19 = vld [vmem:[%s3493_s28 + $0x2b8] sm:$0xff]  ;;  %v3227_v23 = vld [vmem:[%s3493_s28 + $0x2b0] sm:$0xff] }
  0xf3   : > { %1978 = vmatpush.bf16.msrb.mxu1 %v3192_v55  ;;  %1992 = vmatpush.bf16.msrb.mxu2 %v3200_v56  ;;  %v3222_v56 = vld [vmem:[%s3493_s28 + $0x288] sm:$0xff] }
  0xf5   : > { %v488_v26 = vpop.f32.mrf.mxu0 }
  0xf6   : > { %v3313_v29 = vpack.c.bf16 %v488_v26, %v483_v14  ;;  %v3206_v14 = vld [vmem:[%s3493_s28 + $0x208] sm:$0xff]  ;;  %v548_v26 = vpop.f32.mrf.mxu2 }
  0xf7   : > { %v2416_v36 = vld [vmem:[#allocation3 + $0x8] sm:$0xf]  ;;  %v3124_v38 = vld [vmem:[#allocation3 + $0xc] sm:$0xf]  ;;  %1979 = vmatpush.bf16.msrb.mxu1 %v3191_v59  ;;  %1993 = vmatpush.bf16.msrb.mxu2 %v3199_v60  ;;  %v3221_v60 = vld [vmem:[%s3493_s28 + $0x280] sm:$0xff] }
  0xf8   : > { %3387 = vst [vmem:[#allocation3 + $0x50] sm:$0xff] %v3313_v29   ;;  %v541_v29 = vpop.f32.mrf.mxu1  ;;  %v3230_v59 = vld [vmem:[%s3493_s28 + $0x2c8] sm:$0xff] }
  0xfb   : > { %1980 = vmatpush.bf16.msrb.mxu1 %v3190_v63  ;;  %1994 = vmatpush.bf16.msrb.mxu2 %v3198_v0  ;;  %v3252_v63 = vld [vmem:[%s3493_s28 + $0x378] sm:$0xff] }
  0xfd   : > { %v491_v33 = vpop.f32.mrf.mxu0 }
  0xff   : > { %v3133_v37 = vld [vmem:[#allocation3 + $0x4c] sm:$0xf0]  ;;  %v2418_v39 = vld [vmem:[#allocation3 + $0x50] sm:$0xf0]  ;;  %1981 = vmatpush.bf16.msrb.mxu1 %v3189_v3  ;;  %1995 = vmatpush.bf16.msrb.mxu2 %v3197_v4  ;;  %v3242_v3 = vld [vmem:[%s3493_s28 + $0x328] sm:$0xff] }
 0x100   : > { %530 = vmatmul.bf16.gmra.mxu0 %v3118_v32  ;;  %v2417_v40 = vor.u32 %v3133_v37, %v2416_v36  ;;  %v2421_v41 = vor.u32 %v3124_v38, %v2418_v39  ;;  %v3368_v32 = vpack.c.bf16 %v546_v16, %v541_v29  ;;  %v551_v37 = vpop.f32.mrf.mxu2  ;;  %v3215_v38 = vld [vmem:[%s3493_s28 + $0x250] sm:$0xff]  ;;  %v3250_v4 = vld [vmem:[%s3493_s28 + $0x368] sm:$0xff]  ;;  %v3268_v29 = vld [vmem:[%s3493_s28 + $0x3f8] sm:$0xff] }
 0x101   : > { %v588_v42 = vpack.c.bf16 %v551_v37, %v551_v37  ;;  %v3238_v16 = vld [vmem:[%s3493_s28 + $0x308] sm:$0xff]  ;;  %v3265_v37 = vld [vmem:[%s3493_s28 + $0x3e0] sm:$0xff] }
 0x102   : > { %1926 = vmatmul.bf16.vlgmr.msra.gmra.mxu3 %v2417_v40  ;;  %1940 = vmatmul.bf16.vlgmr.msra.gmra.mxu1 %v2421_v41  ;;  %3398 = vst [vmem:[#allocation3 + $0x38] sm:$0xff] %v3368_v32   ;;  %v543_v40 = vpop.f32.mrf.mxu1  ;;  %v3224_v41 = vld [vmem:[%s3493_s28 + $0x298] sm:$0xff]  ;;  %v3267_v32 = vld [vmem:[%s3493_s28 + $0x3f0] sm:$0xff] }
 0x103   : > { %2002 = vmatpush.bf16.msra.mxu3 %v3212_v47  ;;  %2016 = vmatpush.bf16.msra.mxu1 %v3220_v13  ;;  %v3373_v43 = vpack.c.bf16 %v548_v26, %v543_v40  ;;  %622 = vst [vmem:[#allocation3 + $0x40] sm:$0xf] %v588_v42  ;;  %v3231_v47 = vld [vmem:[%s3493_s28 + $0x2d0] sm:$0xff]  ;;  %v3264_v40 = vld [vmem:[%s3493_s28 + $0x3d8] sm:$0xff] }
 0x104   : > { %v3263_v42 = vld [vmem:[%s3493_s28 + $0x3d0] sm:$0xff] }
 0x105   : > { %v493_v44 = vpop.f32.mrf.mxu0  ;;  %3399 = vst [vmem:[#allocation3 + $0x80] sm:$0xff] %v3373_v43  }
 0x107   : > { %2003 = vmatpush.bf16.msra.mxu3 %v3211_v54  ;;  %2017 = vmatpush.bf16.msra.mxu1 %v3219_v17  ;;  %v3246_v17 = vld [vmem:[%s3493_s28 + $0x348] sm:$0xff] }
 0x108   : > { %v553_v49 = vpop.f32.mrf.mxu2 }
 0x10b   : > { %2004 = vmatpush.bf16.msra.mxu3 %v3210_v57  ;;  %2018 = vmatpush.bf16.msra.mxu1 %v3218_v22 }
 0x10d   : > { %v496_v50 = vpop.f32.mrf.mxu0 }
 0x10e   : > { %v3318_v53 = vpack.c.bf16 %v496_v50, %v491_v33  ;;  %v3216_v33 = vld [vmem:[%s3493_s28 + $0x258] sm:$0xff]  ;;  %v3213_v50 = vld [vmem:[%s3493_s28 + $0x240] sm:$0xff] }
 0x10f   : > { %2005 = vmatpush.bf16.msra.mxu3 %v3209_v62  ;;  %2019 = vmatpush.bf16.msra.mxu1 %v3217_v27  ;;  %v3244_v62 = vld [vmem:[%s3493_s28 + $0x338] sm:$0xff]  ;;  %v3237_v27 = vld [vmem:[%s3493_s28 + $0x300] sm:$0xff] }
 0x110   : > { %3388 = vst [vmem:[#allocation3 + $0x10] sm:$0xff] %v3318_v53   ;;  %v589_v53 = vpack.c.bf16 %v553_v49, %v553_v49  ;;  %v3253_v49 = vld [vmem:[%s3493_s28 + $0x380] sm:$0xff] }
 0x112   : > { %623 = vst [vmem:[#allocation3 + $0x88] sm:$0xf] %v589_v53 }
 0x113   : > { %2006 = vmatpush.bf16.msra.mxu3 %v3208_v1  ;;  %2020 = vmatpush.bf16.msra.mxu1 %v3216_v33  ;;  %v3243_v1 = vld [vmem:[%s3493_s28 + $0x330] sm:$0xff]  ;;  %v3258_v33 = vld [vmem:[%s3493_s28 + $0x3a8] sm:$0xff] }
 0x115   : > { %v498_v58 = vpop.f32.mrf.mxu0 }
 0x116   : > { %v3323_v61 = vpack.c.bf16 %v498_v58, %v493_v44  ;;  %v3232_v44 = vld [vmem:[%s3493_s28 + $0x2d8] sm:$0xff] }
 0x117   : > { %v2424_v6 = vld [vmem:[#allocation3 + $0x10] sm:$0xf]  ;;  %v3125_v8 = vld [vmem:[#allocation3 + $0x14] sm:$0xf]  ;;  %2007 = vmatpush.bf16.msra.mxu3 %v3207_v5  ;;  %2021 = vmatpush.bf16.msra.mxu1 %v3215_v38 }
 0x118   : > { %3389 = vst [vmem:[#allocation3 + $0x58] sm:$0xff] %v3323_v61   ;;  %v3229_v61 = vld [vmem:[%s3493_s28 + $0x2c0] sm:$0xff] }
 0x11b   : > { %2008 = vmatpush.bf16.msra.mxu3 %v3206_v14  ;;  %2022 = vmatpush.bf16.msra.mxu1 %v3214_v45  ;;  %v3239_v14 = vld [vmem:[%s3493_s28 + $0x310] sm:$0xff]  ;;  %v3254_v45 = vld [vmem:[%s3493_s28 + $0x388] sm:$0xff] }
 0x11d   : > { %v501_v2 = vpop.f32.mrf.mxu0 }
 0x11f   : > { %v3134_v7 = vld [vmem:[#allocation3 + $0x54] sm:$0xf0]  ;;  %v2426_v9 = vld [vmem:[#allocation3 + $0x58] sm:$0xf0]  ;;  %2009 = vmatpush.bf16.msra.mxu3 %v3205_v18  ;;  %2023 = vmatpush.bf16.msra.mxu1 %v3213_v50  ;;  %v3261_v50 = vld [vmem:[%s3493_s28 + $0x3c0] sm:$0xff] }
 0x120   : > { %v2425_v11 = vor.u32 %v3134_v7, %v2424_v6  ;;  %v2429_v12 = vor.u32 %v3125_v8, %v2426_v9  ;;  %v3241_v7 = vld [vmem:[%s3493_s28 + $0x320] sm:$0xff]  ;;  %v3240_v9 = vld [vmem:[%s3493_s28 + $0x318] sm:$0xff] }
 0x121   : > { %v3249_v8 = vld [vmem:[%s3493_s28 + $0x360] sm:$0xff] }
 0x122   : > { %1954 = vmatmul.bf16.vlgmr.msra.gmra.mxu2 %v2425_v11  ;;  %1968 = vmatmul.bf16.vlgmr.msrb.gmra.mxu3 %v2429_v12  ;;  %v3248_v11 = vld [vmem:[%s3493_s28 + $0x358] sm:$0xff] }
 0x123   : > { %2030 = vmatpush.bf16.msra.mxu2 %v3228_v19  ;;  %2044 = vmatpush.bf16.msrb.mxu3 %v3236_v20  ;;  %v3260_v20 = vld [vmem:[%s3493_s28 + $0x3b8] sm:$0xff] }
 0x125   : > { %v503_v15 = vpop.f32.mrf.mxu0 }
 0x127   : > { %2031 = vmatpush.bf16.msra.mxu2 %v3227_v23  ;;  %2045 = vmatpush.bf16.msrb.mxu3 %v3235_v24 }
 0x12b   : > { %2032 = vmatpush.bf16.msra.mxu2 %v3226_v30  ;;  %2046 = vmatpush.bf16.msrb.mxu3 %v3234_v31  ;;  %v3259_v30 = vld [vmem:[%s3493_s28 + $0x3b0] sm:$0xff] }
 0x12d   : > { %v506_v25 = vpop.f32.mrf.mxu0 }
 0x12e   : > { %v3328_v28 = vpack.c.bf16 %v506_v25, %v501_v2  ;;  %v3251_v2 = vld [vmem:[%s3493_s28 + $0x370] sm:$0xff] }
 0x12f   : > { %2033 = vmatpush.bf16.msra.mxu2 %v3225_v34  ;;  %2047 = vmatpush.bf16.msrb.mxu3 %v3233_v35  ;;  %v3266_v34 = vld [vmem:[%s3493_s28 + $0x3e8] sm:$0xff]  ;;  %v3257_v35 = vld [vmem:[%s3493_s28 + $0x3a0] sm:$0xff] }
 0x130   : > { %3390 = vst [vmem:[#allocation3 + $0x18] sm:$0xff] %v3328_v28   ;;  %v3245_v28 = vld [vmem:[%s3493_s28 + $0x340] sm:$0xff] }
 0x133   : > { %2034 = vmatpush.bf16.msra.mxu2 %v3224_v41  ;;  %2048 = vmatpush.bf16.msrb.mxu3 %v3232_v44  ;;  %v3255_v41 = vld [vmem:[%s3493_s28 + $0x390] sm:$0xff] }
 0x135   : > { %v508_v36 = vpop.f32.mrf.mxu0 }
 0x136   : > { %v3333_v39 = vpack.c.bf16 %v508_v36, %v503_v15  ;;  %v3247_v15 = vld [vmem:[%s3493_s28 + $0x350] sm:$0xff] }
 0x137   : > { %2035 = vmatpush.bf16.msra.mxu2 %v3223_v46  ;;  %v2432_v51 = vld [vmem:[#allocation3 + $0x18] sm:$0xf]  ;;  %v3126_v52 = vld [vmem:[#allocation3 + $0x1c] sm:$0xf]  ;;  %2049 = vmatpush.bf16.msrb.mxu3 %v3231_v47  ;;  %v3262_v46 = vld [vmem:[%s3493_s28 + $0x3c8] sm:$0xff] }
 0x138   : > { %3391 = vst [vmem:[#allocation3 + $0x60] sm:$0xff] %v3333_v39   ;;  %v3256_v39 = vld [vmem:[%s3493_s28 + $0x398] sm:$0xff]  ;;  %v262_v47 = vld [vmem:[#allocation2] sm:$0xf] }
 0x139   : > { %624 = vst [vmem:[#allocation3 + $0x44] sm:$0xf] %v262_v47  ;;  %v3432_v47 = vld [vmem:[%s225_s24] ss:$0 sm:$0xff] }
 0x13b   : > { %2036 = vmatpush.bf16.msra.mxu2 %v3222_v56  ;;  %2050 = vmatpush.bf16.msrb.mxu3 %v3230_v59 }
 0x13d   : > { %v511_v48 = vpop.f32.mrf.mxu0 }
 0x13f   : > { %v3135_v54 = vld [vmem:[#allocation3 + $0x5c] sm:$0xf0]  ;;  %v2434_v55 = vld [vmem:[#allocation3 + $0x60] sm:$0xf0]  ;;  %2037 = vmatpush.bf16.msra.mxu2 %v3221_v60  ;;  %2051 = vmatpush.bf16.msrb.mxu3 %v3229_v61  ;;  %v3283_v61 = vld [vmem:[%s3493_s28 + $0x470] sm:$0xff] }
 0x140   : > { %v2433_v57 = vor.u32 %v3135_v54, %v2432_v51  ;;  %v2437_v58 = vor.u32 %v3126_v52, %v2434_v55  ;;  %v3276_v54 = vld [vmem:[%s3493_s28 + $0x438] sm:$0xff] }
 0x141   : > { %v3284_v55 = vld [vmem:[%s3493_s28 + $0x478] sm:$0xff] }
 0x142   : > { %1982 = vmatmul.bf16.vlgmr.msrb.gmra.mxu1 %v2433_v57  ;;  %1996 = vmatmul.bf16.vlgmr.msrb.gmra.mxu2 %v2437_v58 }
 0x143   : > { %2058 = vmatpush.bf16.msrb.mxu1 %v3244_v62  ;;  %2072 = vmatpush.bf16.msrb.mxu2 %v3252_v63 }
 0x145   : > { %v513_v0 = vpop.f32.mrf.mxu0 }
 0x147   : > { %2059 = vmatpush.bf16.msrb.mxu1 %v3243_v1  ;;  %2073 = vmatpush.bf16.msrb.mxu2 %v3251_v2  ;;  %v3282_v1 = vld [vmem:[%s3493_s28 + $0x468] sm:$0xff]  ;;  %v3273_v2 = vld [vmem:[%s3493_s28 + $0x420] sm:$0xff] }
 0x14b   : > { %2060 = vmatpush.bf16.msrb.mxu1 %v3242_v3  ;;  %2074 = vmatpush.bf16.msrb.mxu2 %v3250_v4  ;;  %v3281_v3 = vld [vmem:[%s3493_s28 + $0x460] sm:$0xff]  ;;  %v2464_v4 = vld [vmem:[#allocation3 + $0x38] sm:$0xf] }
 0x14d   : > { %v516_v5 = vpop.f32.mrf.mxu0 }
 0x14e   : > { %v3338_v6 = vpack.c.bf16 %v516_v5, %v511_v48  ;;  %v263_v48 = vld [vmem:[#allocation2 + $0x4] sm:$0xf] }
 0x14f   : > { %2061 = vmatpush.bf16.msrb.mxu1 %v3241_v7  ;;  %2075 = vmatpush.bf16.msrb.mxu2 %v3249_v8  ;;  %625 = vst [vmem:[#allocation3 + $0x8c] sm:$0xf] %v263_v48  ;;  %v3272_v7 = vld [vmem:[%s3493_s28 + $0x418] sm:$0xff] }
 0x150   : > { %3392 = vst [vmem:[#allocation3 + $0x20] sm:$0xff] %v3338_v6   ;;  %v3139_v6 = vld [vmem:[#allocation3 + $0x7c] sm:$0xf0] }
 0x153   : > { %2062 = vmatpush.bf16.msrb.mxu1 %v3240_v9  ;;  %2076 = vmatpush.bf16.msrb.mxu2 %v3248_v11 }
 0x155   : > { %v518_v12 = vpop.f32.mrf.mxu0 }
 0x156   : > { %v3343_v13 = vpack.c.bf16 %v518_v12, %v513_v0  ;;  %v3274_v0 = vld [vmem:[%s3493_s28 + $0x428] sm:$0xff] }
 0x157   : > { %2063 = vmatpush.bf16.msrb.mxu1 %v3239_v14  ;;  %2077 = vmatpush.bf16.msrb.mxu2 %v3247_v15  ;;  %v2440_v19 = vld [vmem:[#allocation3 + $0x20] sm:$0xf]  ;;  %v3127_v23 = vld [vmem:[#allocation3 + $0x24] sm:$0xf]  ;;  %v2465_v14 = vor.u32 %v3139_v6, %v2464_v4  ;;  %v3271_v15 = vld [vmem:[%s3493_s28 + $0x410] sm:$0xff] }
 0x158   : > { %3393 = vst [vmem:[#allocation3 + $0x68] sm:$0xff] %v3343_v13   ;;  %v3280_v13 = vld [vmem:[%s3493_s28 + $0x458] sm:$0xff] }
 0x15b   : > { %2064 = vmatpush.bf16.msrb.mxu1 %v3238_v16  ;;  %2078 = vmatpush.bf16.msrb.mxu2 %v3246_v17  ;;  %v3279_v16 = vld [vmem:[%s3493_s28 + $0x450] sm:$0xff]  ;;  %v3270_v17 = vld [vmem:[%s3493_s28 + $0x408] sm:$0xff] }
 0x15d   : > { %v521_v18 = vpop.f32.mrf.mxu0 }
 0x15f   : > { %v3136_v22 = vld [vmem:[#allocation3 + $0x64] sm:$0xf0]  ;;  %v2442_v24 = vld [vmem:[#allocation3 + $0x68] sm:$0xf0]  ;;  %2065 = vmatpush.bf16.msrb.mxu1 %v3237_v27  ;;  %2079 = vmatpush.bf16.msrb.mxu2 %v3245_v28 }
 0x160   : > { %v2441_v25 = vor.u32 %v3136_v22, %v2440_v19  ;;  %v2445_v26 = vor.u32 %v3127_v23, %v2442_v24  ;;  %v3269_v19 = vld [vmem:[%s3493_s28 + $0x400] sm:$0xff]  ;;  %v2474_v24 = vld [vmem:[#allocation3 + $0x88] sm:$0xf0]  ;;  %v3140_v27 = vld [vmem:[#allocation3 + $0x84] sm:$0xf0] }
 0x161   : > { %v3277_v22 = vld [vmem:[%s3493_s28 + $0x440] sm:$0xff] }
 0x162   : > { %2010 = vmatmul.bf16.vlgmr.msra.gmra.mxu3 %v2441_v25  ;;  %2024 = vmatmul.bf16.vlgmr.msra.gmra.mxu1 %v2445_v26  ;;  %v3131_v23 = vld [vmem:[#allocation3 + $0x44] sm:$0xf]  ;;  %v2472_v26 = vld [vmem:[#allocation3 + $0x40] sm:$0xf] }
 0x163   : > { %2086 = vmatpush.bf16.msra.mxu3 %v3260_v20  ;;  %2100 = vmatpush.bf16.msra.mxu1 %v3268_v29  ;;  %v3130_v20 = vld [vmem:[#allocation3 + $0x3c] sm:$0xf]  ;;  %v2466_v25 = vld [vmem:[#allocation3 + $0x80] sm:$0xf0]  ;;  %v2477_v28 = vor.u32 %v3131_v23, %v2474_v24 }
 0x164   : > { %v2469_v29 = vor.u32 %v3130_v20, %v2466_v25 }
 0x165   : > { %v523_v31 = vpop.f32.mrf.mxu0 }
 0x167   : > { %2087 = vmatpush.bf16.msra.mxu3 %v3259_v30  ;;  %2101 = vmatpush.bf16.msra.mxu1 %v3267_v32  ;;  %v2473_v30 = vor.u32 %v3140_v27, %v2472_v26  ;;  %v1913_v32 = vpop.f32.mrf.mxu2 }
 0x16b   : > { %2088 = vmatpush.bf16.msra.mxu3 %v3258_v33  ;;  %2102 = vmatpush.bf16.msra.mxu1 %v3266_v34 }
 0x16d   : > { %v526_v36 = vpop.f32.mrf.mxu0 }
 0x16e   : > { %v3348_v38 = vpack.c.bf16 %v526_v36, %v521_v18  ;;  %v3278_v18 = vld [vmem:[%s3493_s28 + $0x448] sm:$0xff] }
 0x16f   : > { %2089 = vmatpush.bf16.msra.mxu3 %v3257_v35  ;;  %2103 = vmatpush.bf16.msra.mxu1 %v3265_v37  ;;  %v1915_v35 = vpop.f32.mrf.mxu2 }
 0x170   : > { %3394 = vst [vmem:[#allocation3 + $0x28] sm:$0xff] %v3348_v38  }
 0x173   : > { %2090 = vmatpush.bf16.msra.mxu3 %v3256_v39  ;;  %2104 = vmatpush.bf16.msra.mxu1 %v3264_v40 }
 0x175   : > { %v528_v43 = vpop.f32.mrf.mxu0 }
 0x176   : > { %v3353_v44 = vpack.c.bf16 %v528_v43, %v523_v31  ;;  %v1899_v31 = vpop.f32.mrf.mxu1 }
 0x177   : > { %2091 = vmatpush.bf16.msra.mxu3 %v3255_v41  ;;  %2105 = vmatpush.bf16.msra.mxu1 %v3263_v42  ;;  %v2448_v53 = vld [vmem:[#allocation3 + $0x28] sm:$0xf]  ;;  %v3128_v57 = vld [vmem:[#allocation3 + $0x2c] sm:$0xf]  ;;  %v1900_v48 = vadd.f32 %v3432_v47, %v1899_v31 }
 0x178   : > { %3395 = vst [vmem:[#allocation3 + $0x70] sm:$0xff] %v3353_v44  }
 0x17b   : > { %2092 = vmatpush.bf16.msra.mxu3 %v3254_v45  ;;  %2106 = vmatpush.bf16.msra.mxu1 %v3262_v46 }
 0x17d   : > { %v531_v51 = vpop.f32.mrf.mxu0 }
 0x17e   : > { %v3358_v52 = vpack.c.bf16 %v3641_v10, %v531_v51  ;;  %v3275_v10 = vld [vmem:[%s3493_s28 + $0x430] sm:$0xff]  ;;  %v1901_v34 = vpop.f32.mrf.mxu1 }
 0x17f   : > { %v3137_v56 = vld [vmem:[#allocation3 + $0x6c] sm:$0xf0]  ;;  %v2450_v58 = vld [vmem:[#allocation3 + $0x70] sm:$0xf0]  ;;  %2093 = vmatpush.bf16.msra.mxu3 %v3253_v49  ;;  %2107 = vmatpush.bf16.msra.mxu1 %v3261_v50 }
 0x180   : > { %3396 = vst [vmem:[#allocation3 + $0x30] sm:$0xff] %v3358_v52   ;;  %v2449_v59 = vor.u32 %v3137_v56, %v2448_v53  ;;  %v2453_v60 = vor.u32 %v3128_v57, %v2450_v58  ;;  %v1914_v52 = vadd.f32 %v1913_v32, %v1900_v48 }
 0x182   : > { %2038 = vmatmul.bf16.vlgmr.msra.gmra.mxu2 %v2449_v59  ;;  %2052 = vmatmul.bf16.vlgmr.msrb.gmra.mxu3 %v2453_v60 }
 0x183   : > { %2114 = vmatpush.bf16.msra.mxu2 %v3276_v54  ;;  %2128 = vmatpush.bf16.msrb.mxu3 %v3284_v55  ;;  %v1902_v54 = vadd.f32 %v3432_v47, %v1901_v34 }
 0x185   : > { %v533_v62 = vpop.f32.mrf.mxu0  ;;  %v1927_v33 = vpop.f32.mrf.mxu3  ;;  %v1916_v58 = vadd.f32 %v1915_v35, %v1902_v54 }
 0x186   : > { %v3363_v63 = vpack.c.bf16 %v3649_v21, %v533_v62  ;;  %v1941_v36 = vpop.f32.mrf.mxu1  ;;  %v1928_v53 = vadd.f32 %v1927_v33, %v1914_v52 }
 0x187   : > { %2115 = vmatpush.bf16.msra.mxu2 %v3275_v10  ;;  %2129 = vmatpush.bf16.msrb.mxu3 %v3283_v61  ;;  %v2456_v5 = vld [vmem:[#allocation3 + $0x30] sm:$0xf]  ;;  %v3129_v8 = vld [vmem:[#allocation3 + $0x34] sm:$0xf] }
 0x188   : > { %3397 = vst [vmem:[#allocation3 + $0x78] sm:$0xff] %v3363_v63   ;;  %v1942_v55 = vadd.f32 %v1941_v36, %v1928_v53 }
 0x18b   : > { %2116 = vmatpush.bf16.msra.mxu2 %v3274_v0  ;;  %2130 = vmatpush.bf16.msrb.mxu3 %v3282_v1 }
 0x18d   : > { %v1929_v37 = vpop.f32.mrf.mxu3 }
 0x18e   : > { %v1943_v40 = vpop.f32.mrf.mxu1  ;;  %v1930_v10 = vadd.f32 %v1929_v37, %v1916_v58 }
 0x18f   : > { %2117 = vmatpush.bf16.msra.mxu2 %v3273_v2  ;;  %2131 = vmatpush.bf16.msrb.mxu3 %v3281_v3  ;;  %v3138_v21 = vld [vmem:[#allocation3 + $0x74] sm:$0xf0]  ;;  %v2458_v9 = vld [vmem:[#allocation3 + $0x78] sm:$0xf0] }
 0x190   : > { %v2457_v11 = vor.u32 %v3138_v21, %v2456_v5  ;;  %v2461_v12 = vor.u32 %v3129_v8, %v2458_v9  ;;  %v1944_v62 = vadd.f32 %v1943_v40, %v1930_v10 }
 0x192   : > { %2066 = vmatmul.bf16.vlgmr.msrb.gmra.mxu1 %v2457_v11  ;;  %2080 = vmatmul.bf16.vlgmr.msrb.gmra.mxu2 %v2461_v12 }
 0x193   : > { %2094 = vmatmul.bf16.vlgmr.msra.gmra.mxu3 %v2465_v14  ;;  %2118 = vmatpush.bf16.msra.mxu2 %v3272_v7 }
 0x194   : > { %2132 = vmatpush.bf16.msrb.mxu3 %v3280_v13 }
 0x197   : > { %2119 = vmatpush.bf16.msra.mxu2 %v3271_v15 }
 0x198   : > { %2133 = vmatpush.bf16.msrb.mxu3 %v3279_v16 }
 0x19b   : > { %2120 = vmatpush.bf16.msra.mxu2 %v3270_v17 }
 0x19c   : > { %2134 = vmatpush.bf16.msrb.mxu3 %v3278_v18 }
 0x19f   : > { %2121 = vmatpush.bf16.msra.mxu2 %v3269_v19 }
 0x1a0   : > { %2135 = vmatpush.bf16.msrb.mxu3 %v3277_v22 }
 0x1a2   : > { %2108 = vmatmul.bf16.vlgmr.msra.gmra.mxu1 %v2469_v29  ;;  %2122 = vmatmul.bf16.vlgmr.msra.gmra.mxu2 %v2473_v30 }
 0x1a3   : > { %2136 = vmatmul.bf16.vlgmr.msrb.gmra.mxu3 %v2477_v28 }
 0x1a5   : > { %v1955_v38 = vpop.f32.mrf.mxu2  ;;  %v1969_v39 = vpop.f32.mrf.mxu3 }
 0x1a6   : > { %v1956_v59 = vadd.f32 %v1955_v38, %v1942_v55 }
 0x1a8   : > { %v1970_v61 = vadd.f32 %v1969_v39, %v1956_v59 }
 0x1ad   : > { %v1957_v41 = vpop.f32.mrf.mxu2  ;;  %v1971_v42 = vpop.f32.mrf.mxu3 }
 0x1ae   : > { %v1958_v2 = vadd.f32 %v1957_v41, %v1944_v62 }
 0x1b0   : > { %v1972_v6 = vadd.f32 %v1971_v42, %v1958_v2 }
 0x1bf   : > { %v1983_v43 = vpop.f32.mrf.mxu1 }
 0x1c0   : > { %v1984_v63 = vadd.f32 %v1983_v43, %v1970_v61 }
 0x1c5   : > { %v1997_v44 = vpop.f32.mrf.mxu2 }
 0x1c6   : > { %v1998_v3 = vadd.f32 %v1997_v44, %v1984_v63 }
 0x1c7   : > { %v1985_v46 = vpop.f32.mrf.mxu1 }
 0x1c8   : > { %v1986_v7 = vadd.f32 %v1985_v46, %v1972_v6 }
 0x1cd   : > { %v1999_v49 = vpop.f32.mrf.mxu2 }
 0x1ce   : > { %v2000_v9 = vadd.f32 %v1999_v49, %v1986_v7 }
 0x1df   : > { %v2025_v50 = vpop.f32.mrf.mxu1 }
 0x1e5   : > { %v2011_v45 = vpop.f32.mrf.mxu3 }
 0x1e6   : > { %v2012_v5 = vadd.f32 %v2011_v45, %v1998_v3 }
 0x1e7   : > { %v2027_v60 = vpop.f32.mrf.mxu1 }
 0x1e8   : > { %v2026_v21 = vadd.f32 %v2025_v50, %v2012_v5 }
 0x1ed   : > { %v2013_v51 = vpop.f32.mrf.mxu3 }
 0x1ee   : > { %v2014_v14 = vadd.f32 %v2013_v51, %v2000_v9 }
 0x1f0   : > { %v2028_v16 = vadd.f32 %v2027_v60, %v2014_v14 }
 0x205   : > { %v2039_v56 = vpop.f32.mrf.mxu2  ;;  %v2053_v57 = vpop.f32.mrf.mxu3 }
 0x206   : > { %v2040_v11 = vadd.f32 %v2039_v56, %v2026_v21 }
 0x208   : > { %v2054_v15 = vadd.f32 %v2053_v57, %v2040_v11 }
 0x20d   : > { %v2041_v0 = vpop.f32.mrf.mxu2  ;;  %v2055_v1 = vpop.f32.mrf.mxu3 }
 0x20e   : > { %v2042_v19 = vadd.f32 %v2041_v0, %v2028_v16 }
 0x20f   : > { %v2067_v4 = vpop.f32.mrf.mxu1 }
 0x210   : > { %v2068_v17 = vadd.f32 %v2067_v4, %v2054_v15  ;;  %v2056_v24 = vadd.f32 %v2055_v1, %v2042_v19 }
 0x215   : > { %v2081_v8 = vpop.f32.mrf.mxu2 }
 0x216   : > { %v2095_v12 = vpop.f32.mrf.mxu3  ;;  %v2082_v20 = vadd.f32 %v2081_v8, %v2068_v17 }
 0x217   : > { %v2069_v13 = vpop.f32.mrf.mxu1 }
 0x218   : > { %v2096_v25 = vadd.f32 %v2095_v12, %v2082_v20  ;;  %v2070_v26 = vadd.f32 %v2069_v13, %v2056_v24 }
 0x21d   : > { %v2083_v18 = vpop.f32.mrf.mxu2 }
 0x21e   : > { %v2097_v22 = vpop.f32.mrf.mxu3  ;;  %v2084_v29 = vadd.f32 %v2083_v18, %v2070_v26 }
 0x21f   : > { %v2109_v23 = vpop.f32.mrf.mxu1 }
 0x220   : > { %v2110_v27 = vadd.f32 %v2109_v23, %v2096_v25  ;;  %v2098_v34 = vadd.f32 %v2097_v22, %v2084_v29 }
 0x225   : > { %v2123_v28 = vpop.f32.mrf.mxu2 }
 0x226   : > { %v2124_v30 = vadd.f32 %v2123_v28, %v2110_v27  ;;  %v2137_v31 = vpop.f32.mrf.mxu3 }
 0x227   : > { %v2111_v33 = vpop.f32.mrf.mxu1 }
 0x228   : > { %v2138_v32 = vadd.f32 %v2137_v31, %v2124_v30  ;;  %v2112_v35 = vadd.f32 %v2111_v33, %v2098_v34 }
 0x22c   : > { %2145 = sbr.rel (%p3054_p6) target bundleno = 567 (0x237), region = 48 }
 0x22d   : > { %v2125_v36 = vpop.f32.mrf.mxu2 }
 0x22e   : > { %v2126_v37 = vadd.f32 %v2125_v36, %v2112_v35  ;;  %v2139_v38 = vpop.f32.mrf.mxu3 }
 0x230   : > { %v2140_v39 = vadd.f32 %v2139_v38, %v2126_v37 }
 0x231   : > { %v2146_v40 = vmax.f32 %v2138_v32, 0.0 }
 0x232   : > { %v2147_v41 = vmax.f32 %v2140_v39, 0.0 }
 0x234   : > { %v3378_v42 = vpack.c.bf16 %v2147_v41, %v2146_v40 }
 0x236   : > { %3379 = vst [vmem:[#allocation2] sm:$0xff] %v3378_v42  }
 0x237 PF: > { %p3055_p7 = scmp.ne.s32.totalorder %s3477_s19, 2 }
 0x239   : > { %2155 = sbr.rel (%p3055_p7) target bundleno = 742 (0x2e6), region = 52 }
 0x23e   : > { %v3294_v43 = vld [vmem:[#allocation2 + $0x38] sm:$0xff]  ;;  %v3383_v44 = vpack.c.bf16 %v2140_v39, %v2138_v32  ;;  %v3293_v45 = vld [vmem:[#allocation2 + $0x30] sm:$0xff]  ;;  %v3292_v46 = vld [vmem:[#allocation2 + $0x28] sm:$0xff] }
 0x23f   : > { %2240 = vmatpush.bf16.msra.mxu0 %v3294_v43  ;;  %3416 = vmatpush.bf16.msra.mxu1 %v3294_v43  ;;  %v3291_v47 = vld [vmem:[#allocation2 + $0x20] sm:$0xff]  ;;  %v3290_v48 = vld [vmem:[#allocation2 + $0x18] sm:$0xff]  ;;  %v3289_v49 = vld [vmem:[#allocation2 + $0x10] sm:$0xff] }
 0x240   : > { %3384 = vst [vmem:[#allocation2] sm:$0xff] %v3383_v44   ;;  %v3288_v50 = vld [vmem:[#allocation2 + $0x8] sm:$0xff]  ;;  %v3285_v52 = vld [vmem:[%s3753_s4] sm:$0xff] }
 0x241   : > { %v3286_v53 = vld [vmem:[%s3753_s4 + $0x8] sm:$0xff] }
 0x243   : > { %2241 = vmatpush.bf16.msra.mxu0 %v3293_v45  ;;  %3417 = vmatpush.bf16.msra.mxu1 %v3293_v45 }
 0x247   : > { %2242 = vmatpush.bf16.msra.mxu0 %v3292_v46  ;;  %3418 = vmatpush.bf16.msra.mxu1 %v3292_v46  ;;  %v3287_v51 = vld [vmem:[#allocation2] sm:$0xff] }
 0x24b   : > { %2243 = vmatpush.bf16.msra.mxu0 %v3291_v47  ;;  %3419 = vmatpush.bf16.msra.mxu1 %v3291_v47 }
 0x24f   : > { %2244 = vmatpush.bf16.msra.mxu0 %v3290_v48  ;;  %3420 = vmatpush.bf16.msra.mxu1 %v3290_v48 }
 0x253   : > { %2245 = vmatpush.bf16.msra.mxu0 %v3289_v49  ;;  %3421 = vmatpush.bf16.msra.mxu1 %v3289_v49 }
 0x257   : > { %2246 = vmatpush.bf16.msra.mxu0 %v3288_v50  ;;  %3422 = vmatpush.bf16.msra.mxu1 %v3288_v50 }
 0x25b   : > { %2247 = vmatpush.bf16.msra.mxu0 %v3287_v51  ;;  %3423 = vmatpush.bf16.msra.mxu1 %v3287_v51 }
 0x25e   : > { %2248 = vmatmul.bf16.vlgmr.msra.gmra.mxu0 %v3285_v52  ;;  %2253 = vmatmul.bf16.vlgmr.msra.gmra.mxu1 %v3286_v53 }
 0x2db   : > { %v2249_v54 = vpop.f32.mrf.mxu0  ;;  %v2254_v55 = vpop.f32.mrf.mxu1 }
 0x2dc   : > { %2259 = vst [vmem:[%s3754_s5] sm:$0xff] %v2249_v54 }
 0x2dd   : > { %2261 = vst [vmem:[%s3754_s5 + $0x10] sm:$0xff] %v2254_v55 }
 0x2e3   : > { %v2251_v56 = vpop.f32.mrf.mxu0  ;;  %v2256_v57 = vpop.f32.mrf.mxu1 }
 0x2e4   : > { %2260 = vst [vmem:[%s3754_s5 + $0x8] sm:$0xff] %v2251_v56 }
 0x2e5   : > { %2262 = vst [vmem:[%s3754_s5 + $0x18] sm:$0xff] %v2256_v57 }
 0x2e6 PF: > { %s15_s18 = sadd.s32 1, %s3439_s18  }
 0x2e7   : > { %p12_p8 = scmp.ge.s32.totalorder %s15_s18, 5  }
 0x2e9   :  { %14 = sbr.rel (!%p12_p8) target bundleno = 1 (0x1), region = 81 }

</bundles_post_ra>
